<compile_context>
chip_gen: v7x
topology: tpu7x:2x2x1
jax: 0.10.0
libtpu: 0.0.40
codegen_flags: <defaults>
</compile_context>

<pallas_src>
import functools

import jax
import jax.numpy as jnp
from jax import lax
from jax.experimental import pallas as pl
from jax.experimental.pallas import tpu as pltpu

# ---- hyper-parameters (stand-ins for args.*) ----
USER = 16          # args.user
ITEM = 16          # args.item
LATDIM = 32        # args.latdim
HYPERNUM = 16      # args.hyperNum
GNN_LAYER = 2      # args.gnn_layer
LEAKY = 0.5        # args.leaky (LeakyReLU is constructed but never used in forward)

N = USER + ITEM


# --------------------------------------------------------------------------
# Fused Pallas kernel: whole forward pass in one call
# --------------------------------------------------------------------------
def _fused_forward_kernel(*refs, user, item, layers, dropout):
    """Computes, fully fused:
         uu = uE @ uHyper ; ii = iE @ iHyper
         G  = blockdiag(uu uu^T, ii ii^T)            (HGNN as one matmul/layer)
         for each layer: gcn = adj @ prev ; hyper = G @ prev ; prev = gcn+hyper
         embeds = sum of all layer outputs (incl. layer 0)
       and writes [embeds | gcn_0 | hyper_0 | ... ] as one lane-dense slab.
    """
    if dropout:
        (adj_ref, ue_ref, ie_ref, uh_ref, ih_ref,
         adj_keep_ref, uu_keep_ref, ii_keep_ref, out_ref) = refs
    else:
        (adj_ref, ue_ref, ie_ref, uh_ref, ih_ref, out_ref) = refs

    f32 = jnp.float32
    adj = adj_ref[...]
    ue = ue_ref[...]
    ie = ie_ref[...]

    # Hyper projections (fused into the same kernel).
    uu = jnp.dot(ue, uh_ref[...], preferred_element_type=f32)   # (user, H)
    ii = jnp.dot(ie, ih_ref[...], preferred_element_type=f32)   # (item, H)

    # Contract dim 1 with dim 1: H @ H^T without materializing a transpose.
    dn = (((1,), (1,)), ((), ()))

    def block_diag_gram(uu_l, ii_l):
        g_u = lax.dot_general(uu_l, uu_l, dn, preferred_element_type=f32)
        g_i = lax.dot_general(ii_l, ii_l, dn, preferred_element_type=f32)
        top = jnp.concatenate([g_u, jnp.zeros((user, item), f32)], axis=1)
        bot = jnp.concatenate([jnp.zeros((item, user), f32), g_i], axis=1)
        return jnp.concatenate([top, bot], axis=0)               # (N, N)

    if not dropout:
        # keep_rate == 1.0: Gram matrix is layer-invariant -> hoist once.
        g_fixed = block_diag_gram(uu, ii)

    prev = jnp.concatenate([ue, ie], axis=0)                     # embeds0 (N, D)
    acc = prev
    pieces = []
    for layer in range(layers):                                  # unrolled (L=2)
        if dropout:
            adj_l = adj * adj_keep_ref[layer]
            g_l = block_diag_gram(uu * uu_keep_ref[layer],
                                  ii * ii_keep_ref[layer])
        else:
            adj_l = adj
            g_l = g_fixed
        gcn = jnp.dot(adj_l, prev, preferred_element_type=f32)   # GCNLayer
        hyper = jnp.dot(g_l, prev, preferred_element_type=f32)   # HGNNLayer (u+i)
        prev = gcn + hyper
        acc = acc + prev
        pieces.append(gcn)
        pieces.append(hyper)

    # Single lane-dense full-tile store of everything the caller needs.
    out_ref[...] = jnp.concatenate([acc] + pieces, axis=1)


def _run_fused_forward(inputs, *, dropout):
    d = LATDIM
    kern = functools.partial(_fused_forward_kernel,
                             user=USER, item=ITEM,
                             layers=GNN_LAYER, dropout=dropout)
    vmem = lambda: pl.BlockSpec(memory_space=pltpu.MemorySpace.VMEM)
    packed = pl.pallas_call(
        kern,
        out_shape=jax.ShapeDtypeStruct((N, (1 + 2 * GNN_LAYER) * d), jnp.float32),
        in_specs=[vmem() for _ in inputs],
        out_specs=vmem(),
    )(*inputs)
    return packed


# --------------------------------------------------------------------------
# Model (parameter init + forward orchestration)
# --------------------------------------------------------------------------
def xavier_uniform(key, shape):
    fan_in, fan_out = shape
    bound = (6.0 / (fan_in + fan_out)) ** 0.5
    return jax.random.uniform(key, shape, jnp.float32, -bound, bound)


def init_params(key):
    k1, k2, k3, k4 = jax.random.split(key, 4)
    return {
        "uEmbeds": xavier_uniform(k1, (USER, LATDIM)),
        "iEmbeds": xavier_uniform(k2, (ITEM, LATDIM)),
        "uHyper": xavier_uniform(k3, (LATDIM, HYPERNUM)),
        "iHyper": xavier_uniform(k4, (LATDIM, HYPERNUM)),
    }


def model_forward(params, adj, keep_rate=1.0, key=None):
    uE, iE = params["uEmbeds"], params["iEmbeds"]
    uH, iH = params["uHyper"], params["iHyper"]
    d, L = LATDIM, GNN_LAYER

    if keep_rate == 1.0:
        packed = _run_fused_forward((adj, uE, iE, uH, iH), dropout=False)
    else:
        # SpAdjDropEdge + F.dropout replicated as per-layer keep-masks fed to
        # the fused kernel.
        # TODO(synk): torch draws its edge-drop / dropout masks with torch RNG;
        # here jax.random is used instead (exact match only for keep_rate==1.0).
        k1, k2, k3 = jax.random.split(key, 3)
        adj_keep = (jax.random.bernoulli(k1, keep_rate, (L,) + adj.shape)
                    .astype(jnp.float32) / keep_rate)
        uu_keep = (jax.random.bernoulli(k2, keep_rate, (L, USER, HYPERNUM))
                   .astype(jnp.float32) / keep_rate)
        ii_keep = (jax.random.bernoulli(k3, keep_rate, (L, ITEM, HYPERNUM))
                   .astype(jnp.float32) / keep_rate)
        packed = _run_fused_forward(
            (adj, uE, iE, uH, iH, adj_keep, uu_keep, ii_keep), dropout=True)

    # Unpack the lane-dense slab: [embeds | gcn_0 | hyper_0 | gcn_1 | hyper_1 ...]
    embeds = packed[:, :d]
    gnn_lats = [packed[:, d * (1 + 2 * l): d * (2 + 2 * l)] for l in range(L)]
    hyper_lats = [packed[:, d * (2 + 2 * l): d * (3 + 2 * l)] for l in range(L)]
    return embeds, gnn_lats, hyper_lats


# --------------------------------------------------------------------------
# Example / self-test
# --------------------------------------------------------------------------
def build_adj(key):
    """Deterministic symmetric normalized bipartite adjacency, dense (N, N)."""
    r = (jax.random.uniform(key, (USER, ITEM)) < 0.3).astype(jnp.float32)
    a = jnp.zeros((N, N), jnp.float32)
    a = a.at[:USER, USER:].set(r)
    a = a.at[USER:, :USER].set(r.T)
    deg = jnp.maximum(a.sum(axis=1), 1.0)
    d_inv_sqrt = 1.0 / jnp.sqrt(deg)
    return a * d_inv_sqrt[:, None] * d_inv_sqrt[None, :]


def reference_forward(params, adj):
    """Pure-jnp reference of the torch forward (keepRate = 1.0)."""
    uE, iE = params["uEmbeds"], params["iEmbeds"]
    embeds = jnp.concatenate([uE, iE], axis=0)
    lats = [embeds]
    gcns, hypers = [], []
    uu = uE @ params["uHyper"]
    ii = iE @ params["iHyper"]
    for _ in range(GNN_LAYER):
        gcn = adj @ lats[-1]
        hu = uu @ (uu.T @ lats[-1][:USER])
        hi = ii @ (ii.T @ lats[-1][USER:])
        hyper = jnp.concatenate([hu, hi], axis=0)
        gcns.append(gcn)
        hypers.append(hyper)
        lats.append(gcn + hyper)
    return functools.reduce(lambda a, b: a + b, lats), gcns, hypers


if __name__ == "__main__":
    key = jax.random.PRNGKey(0)
    k_params, k_adj, k_drop = jax.random.split(key, 3)
    params = init_params(k_params)
    adj = build_adj(k_adj)

    # Main (deterministic) path: keep_rate == 1.0.
    embeds, gnn_lats, hyper_lats = model_forward(params, adj, keep_rate=1.0)
    embeds = jax.block_until_ready(embeds)

    ref_embeds, ref_gcns, ref_hypers = reference_forward(params, adj)
    assert embeds.shape == (N, LATDIM)
    assert len(gnn_lats) == GNN_LAYER and len(hyper_lats) == GNN_LAYER
    assert jnp.allclose(embeds, ref_embeds, atol=1e-4, rtol=1e-4)
    for l in range(GNN_LAYER):
        assert jnp.allclose(gnn_lats[l], ref_gcns[l], atol=1e-4, rtol=1e-4)
        assert jnp.allclose(hyper_lats[l], ref_hypers[l], atol=1e-4, rtol=1e-4)

    # Smoke-test the stochastic (dropout / edge-drop) path compiles and runs.
    e2, g2, h2 = model_forward(params, adj, keep_rate=0.5, key=k_drop)
    e2 = jax.block_until_ready(e2)
    assert e2.shape == (N, LATDIM)
    assert len(g2) == GNN_LAYER and len(h2) == GNN_LAYER

    print("KERNEL_OK")
</pallas_src>

<mosaic_0001>
module attributes {stable_mosaic.version = 11 : i64} {
  func.func @_fused_forward_kernel(%arg0: memref<32x32xf32, #tpu.memory_space<vmem>>, %arg1: memref<16x32xf32, #tpu.memory_space<vmem>>, %arg2: memref<16x32xf32, #tpu.memory_space<vmem>>, %arg3: memref<32x16xf32, #tpu.memory_space<vmem>>, %arg4: memref<32x16xf32, #tpu.memory_space<vmem>>, %arg5: memref<32x160xf32, #tpu.memory_space<vmem>>) attributes {dimension_semantics = [], scalar_prefetch = 0 : i64, scratch_operands = 0 : i64, tpu.core_type = #tpu.core_type<tc>} {
    %c0 = arith.constant 0 : index
    %c0_0 = arith.constant 0 : index
    %0 = vector.load %arg0[%c0, %c0_0] : memref<32x32xf32, #tpu.memory_space<vmem>>, vector<32x32xf32>
    %c0_1 = arith.constant 0 : index
    %c0_2 = arith.constant 0 : index
    %1 = vector.load %arg1[%c0_1, %c0_2] : memref<16x32xf32, #tpu.memory_space<vmem>>, vector<16x32xf32>
    %c0_3 = arith.constant 0 : index
    %c0_4 = arith.constant 0 : index
    %2 = vector.load %arg2[%c0_3, %c0_4] : memref<16x32xf32, #tpu.memory_space<vmem>>, vector<16x32xf32>
    %c0_5 = arith.constant 0 : index
    %c0_6 = arith.constant 0 : index
    %3 = vector.load %arg3[%c0_5, %c0_6] : memref<32x16xf32, #tpu.memory_space<vmem>>, vector<32x16xf32>
    %cst = arith.constant dense<0.000000e+00> : vector<16x16xf32>
    %4 = tpu.matmul %1, %3, %cst {dimension_numbers = #tpu.dot_dimension_numbers<[1], [0], [0], [1], [0, 0, 1, 1], [], []>} : vector<16x32xf32>, vector<32x16xf32>, vector<16x16xf32> -> vector<16x16xf32>
    %c0_7 = arith.constant 0 : index
    %c0_8 = arith.constant 0 : index
    %5 = vector.load %arg4[%c0_7, %c0_8] : memref<32x16xf32, #tpu.memory_space<vmem>>, vector<32x16xf32>
    %cst_9 = arith.constant dense<0.000000e+00> : vector<16x16xf32>
    %6 = tpu.matmul %2, %5, %cst_9 {dimension_numbers = #tpu.dot_dimension_numbers<[1], [0], [0], [1], [0, 0, 1, 1], [], []>} : vector<16x32xf32>, vector<32x16xf32>, vector<16x16xf32> -> vector<16x16xf32>
    %cst_10 = arith.constant dense<0.000000e+00> : vector<16x16xf32>
    %7 = tpu.matmul %4, %4, %cst_10 {dimension_numbers = #tpu.dot_dimension_numbers<[1], [1], [0], [0], [0, 0, 1, 0], [], []>} : vector<16x16xf32>, vector<16x16xf32>, vector<16x16xf32> -> vector<16x16xf32>
    %cst_11 = arith.constant dense<0.000000e+00> : vector<16x16xf32>
    %8 = tpu.matmul %6, %6, %cst_11 {dimension_numbers = #tpu.dot_dimension_numbers<[1], [1], [0], [0], [0, 0, 1, 0], [], []>} : vector<16x16xf32>, vector<16x16xf32>, vector<16x16xf32> -> vector<16x16xf32>
    %cst_12 = arith.constant 0.000000e+00 : f32
    %9 = vector.broadcast %cst_12 : f32 to vector<16x16xf32>
    %10 = tpu.concatenate %7, %9 in 1 : vector<16x16xf32>, vector<16x16xf32> -> vector<16x32xf32>
    %cst_13 = arith.constant 0.000000e+00 : f32
    %11 = vector.broadcast %cst_13 : f32 to vector<16x16xf32>
    %12 = tpu.concatenate %11, %8 in 1 : vector<16x16xf32>, vector<16x16xf32> -> vector<16x32xf32>
    %13 = tpu.concatenate %10, %12 in 0 : vector<16x32xf32>, vector<16x32xf32> -> vector<32x32xf32>
    %14 = tpu.concatenate %1, %2 in 0 : vector<16x32xf32>, vector<16x32xf32> -> vector<32x32xf32>
    %cst_14 = arith.constant dense<0.000000e+00> : vector<32x32xf32>
    %15 = tpu.matmul %0, %14, %cst_14 {dimension_numbers = #tpu.dot_dimension_numbers<[1], [0], [0], [1], [0, 0, 1, 1], [], []>} : vector<32x32xf32>, vector<32x32xf32>, vector<32x32xf32> -> vector<32x32xf32>
    %cst_15 = arith.constant dense<0.000000e+00> : vector<32x32xf32>
    %16 = tpu.matmul %13, %14, %cst_15 {dimension_numbers = #tpu.dot_dimension_numbers<[1], [0], [0], [1], [0, 0, 1, 1], [], []>} : vector<32x32xf32>, vector<32x32xf32>, vector<32x32xf32> -> vector<32x32xf32>
    %17 = arith.addf %15, %16 : vector<32x32xf32>
    %18 = arith.addf %14, %17 : vector<32x32xf32>
    %cst_16 = arith.constant dense<0.000000e+00> : vector<32x32xf32>
    %19 = tpu.matmul %0, %17, %cst_16 {dimension_numbers = #tpu.dot_dimension_numbers<[1], [0], [0], [1], [0, 0, 1, 1], [], []>} : vector<32x32xf32>, vector<32x32xf32>, vector<32x32xf32> -> vector<32x32xf32>
    %cst_17 = arith.constant dense<0.000000e+00> : vector<32x32xf32>
    %20 = tpu.matmul %13, %17, %cst_17 {dimension_numbers = #tpu.dot_dimension_numbers<[1], [0], [0], [1], [0, 0, 1, 1], [], []>} : vector<32x32xf32>, vector<32x32xf32>, vector<32x32xf32> -> vector<32x32xf32>
    %21 = arith.addf %19, %20 : vector<32x32xf32>
    %22 = arith.addf %18, %21 : vector<32x32xf32>
    %23 = tpu.concatenate %22, %15, %16, %19, %20 in 1 : vector<32x32xf32>, vector<32x32xf32>, vector<32x32xf32>, vector<32x32xf32>, vector<32x32xf32> -> vector<32x160xf32>
    %c0_18 = arith.constant 0 : index
    %c0_19 = arith.constant 0 : index
    %24 = vector.load %arg5[%c0_18, %c0_19] : memref<32x160xf32, #tpu.memory_space<vmem>>, vector<32x160xf32>
    tpu.vector_store %arg5[%c0_18, %c0_19], %23 {strides = array<i32>} : memref<32x160xf32, #tpu.memory_space<vmem>>, vector<32x160xf32>,
    return
  }
}

</mosaic_0001>

<bundles_post_ra>
// kernel: tpu_custom_call.1
= control target key start
LH: loop header
LB: loop body
LE: loop exit
PB: predicated region body
PF: predicated region fallthrough
CT: control target
= control target key end

     0   :  { %vm33_vm0 = vcmask 261120   ;;  %s1268_s0 = inlined_call_operand.vmem [shape: f32[32,32], index: 0, kind: input, shape index: {}]   ;;  %s1269_s1 = inlined_call_operand.vmem [shape: f32[16,32], index: 1, kind: input, shape index: {}]   ;;  %s1270_s2 = inlined_call_operand.vmem [shape: f32[16,32], index: 2, kind: input, shape index: {}]   ;;  %s1271_s3 = inlined_call_operand.vmem [shape: f32[32,16], index: 3, kind: input, shape index: {}]   ;;  %s1272_s4 = inlined_call_operand.vmem [shape: f32[32,16], index: 4, kind: input, shape index: {}]   ;;  %s1273_s5 = inlined_call_operand.hbm [shape: f32[32,160], index: 5, kind: output, shape index: {}]  }
   0x1   :  { %v115_v0 = vld [vmem:[%s1272_s4] sm:$0xff]  ;;  %v116_v1 = vld [vmem:[%s1272_s4 + $0x8] sm:$0xff]  ;;  %v117_v2 = vld [vmem:[%s1272_s4 + $0x10] sm:$0xff] }
   0x2   :  { %v1021_v3 = vpack.c.bf16 %v116_v1, %v115_v0  ;;  %v118_v4 = vld [vmem:[%s1272_s4 + $0x18] sm:$0xff]  ;;  %v1154_v5 = vld [vmem:[%s1270_s2] sm:$0xff]  ;;  %v30_v8 = vld [vmem:[%s1271_s3 + $0x8] sm:$0xff] }
   0x3   :  { %v1025_v6 = vpack.c.bf16 %v118_v4, %v117_v2  ;;  %940 = vmatprep.mubr.msk.f32.mxu1 %vm33_vm0, %v1154_v5  ;;  %v29_v7 = vld [vmem:[%s1271_s3] sm:$0xff]  ;;  %v31_v9 = vld [vmem:[%s1271_s3 + $0x10] sm:$0xff]  ;;  %v32_v11 = vld [vmem:[%s1271_s3 + $0x18] sm:$0xff] }
   0x4   :  { %1022 = vmatprep.subr.bf16.mxu1 %v1021_v3  ;;  %v1013_v10 = vpack.c.bf16 %v30_v8, %v29_v7  ;;  %v1173_v12 = vld [vmem:[%s1269_s1] sm:$0xff]  ;;  %v1017_v13 = vpack.c.bf16 %v32_v11, %v31_v9 }
   0x5   :  { %1024 = vmatpush3.bf16.msra.mxu1 %v1021_v3  ;;  %929 = vmatprep.mubr.msk.f32.mxu0 %vm33_vm0, %v1173_v12 }
   0x6   :  { %10 = vsyncpa [#allocation3], 0  ;;  %1026 = vmatprep.subr.bf16.mxu1 %v1025_v6  ;;  %1014 = vmatprep.subr.bf16.mxu0 %v1013_v10  ;;  %v1180_v14 = vld [vmem:[%s1270_s2 + $0x8] sm:$0xff]  ;;  %vm200_vm1 = vcmask 130048   ;;  %v21_v24 = vld [vmem:[%s1268_s0] sm:$0xff]  ;;  %s1103_s21 = smov 16  }
   0x7   :  { %1016 = vmatpush3.bf16.msra.mxu0 %v1013_v10  ;;  %v1185_v15 = vld [vmem:[%s1269_s1 + $0x8] sm:$0xff]  ;;  %vm1030_vm2 = vmpackc.low %vm200_vm1, %vm200_vm1  ;;  %v1045_v23 = vpack.c.bf16 %v1180_v14, %v1154_v5  ;;  %v23_v26 = vld [vmem:[%s1268_s0 + $0x10] sm:$0xff]  ;;  %s1105_s22 = smov 64   ;;  %s1106_s23 = smov 96   ;;  %vm807_vm3 = vcmask 523264   ;;  %vm812_vm4 = vcmask 785408  }
   0x8   :  { %1018 = vmatprep.subr.bf16.mxu0 %v1017_v13  ;;  %v1041_v21 = vpack.c.bf16 %v1185_v15, %v1173_v12  ;;  %v22_v25 = vld [vmem:[%s1268_s0 + $0x8] sm:$0xff]  ;;  %v24_v27 = vld [vmem:[%s1268_s0 + $0x18] sm:$0xff]  ;;  %s1104_s0 = smov 32   ;;  %s1107_s24 = smov [#allocation2]  }
   0x9   :  { %1028 = vmatpush3.bf16.msra.mxu1 %v1025_v6  ;;  %s830_s25 = sshll.u32 %s1107_s24, 4  ;;  %s831_s25 = int_to_ptr.vmem [resolvable:$true] %s830_s25 }
   0xa   :  { %s1079_s26 = scalar_lea.vmem %s831_s25, 1024  ;;  %p1084_p1 = scmp.lt.s32.totalorder %s831_s25, %s831_s25 }
   0xb   :  { %1020 = vmatpush3.bf16.msra.mxu0 %v1017_v13  ;;  %p1080_p0 = scmp.ne.s32.totalorder %s831_s25, %s1079_s26  ;;  %p1085_p2 = scmp.lt.s32.totalorder %s1079_s26, %s1079_s26 }
   0xc   :  { %941 = vmatmul.mubr.msk.f32.vlgmr.msra.gmra.mrb[0].mxu1 %vm33_vm0, %v1180_v14 }
   0xd   :  { %p1086_p3 = por %p1085_p2, %p1084_p1 }
   0xe   :  { %930 = vmatmul.mubr.msk.f32.vlgmr.msra.gmra.mrb[0].mxu0 %vm33_vm0, %v1185_v15 }
   0xf   :  { %p1087_p4 = pnand %p1086_p3, %p1080_p0 }
  0xdf   :  { %v942_v16 = vpop.f32.mrb[0].mxu1 }
  0xe0   :  { %v191_v17 = vpop.f32.mrb[1].mxu1 }
  0xe1   :  { %v1035_v18 = vpack.c.bf16 %v942_v16, %v191_v17  ;;  %954 = vmatprep.mubr.msk.f32.mxu1 %vm200_vm1, %v191_v17  ;;  %v931_v19 = vpop.f32.mrb[0].mxu0 }
  0xe2   :  { %v106_v20 = vpop.f32.mrb[1].mxu0 }
  0xe3   :  { %1037 = vmatprep.subr.msk.bf16.mxu1 %vm1030_vm2, %v1035_v18  ;;  %v1029_v22 = vpack.c.bf16 %v931_v19, %v106_v20  ;;  %947 = vmatprep.mubr.msk.f32.mxu0 %vm200_vm1, %v106_v20 }
  0xe4   :  { %1040 = vmatpush3.bf16.xpose.msk.msra.mxu1 %vm1030_vm2, %v1035_v18 }
  0xe5   :  { %1031 = vmatprep.subr.msk.bf16.mxu0 %vm1030_vm2, %v1029_v22  ;;  %1050 = vmatprep.subr.bf16.mxu1 %v1041_v21 }
  0xe6   :  { %1034 = vmatpush3.bf16.xpose.msk.msra.mxu0 %vm1030_vm2, %v1029_v22 }
  0xe7   :  { %1042 = vmatprep.subr.bf16.mxu0 %v1041_v21 }
  0xeb   :  { %955 = vmatmul.mubr.msk.f32.vlgmr.msra.gmra.mrb[2].mxu1 %vm200_vm1, %v942_v16 }
  0xec   :  { %1052 = vmatpush3.bf16.msra.mxu1 %v1041_v21 }
  0xed   :  { %948 = vmatmul.mubr.msk.f32.vlgmr.msra.gmra.mrb[2].mxu0 %vm200_vm1, %v931_v19  ;;  %1054 = vmatprep.subr.bf16.mxu1 %v1045_v23 }
  0xee   :  { %1044 = vmatpush3.bf16.msra.mxu0 %v1041_v21  ;;  %965 = vmatprep.mubr.msk.f32.mxu0 %vm33_vm0, %v21_v24 }
  0xef   :  { %1046 = vmatprep.subr.bf16.mxu0 %v1045_v23 }
  0xf0   :  { %1056 = vmatpush3.bf16.msra.mxu1 %v1045_v23 }
  0xf2   :  { %1048 = vmatpush3.bf16.msra.mxu0 %v1045_v23 }
  0xf5   :  { %966 = vmatmul.mubr.msk.f32.vlgmr.msra.gmra.mrb[4].mxu0 %vm33_vm0, %v22_v25 }
  0xf6   :  { %968 = vmatprep.mubr.msk.f32.mxu0 %vm33_vm0, %v23_v26 }
  0xf9   :  { %969 = vmatmul.mubr.msk.f32.gmra.mrb[6].mxu0 %vm33_vm0, %v24_v27 }
  0xfa   :  { %993 = vmatprep.mubr.msk.f32.mxu0 %vm33_vm0, %v21_v24 }
 0x1be   :  { %v956_v28 = vpop.f32.mrb[2].mxu1 }
 0x1bf   :  { %v354_v29 = vpop.f32.mrb[3].mxu1 }
 0x1c0   :  { %367 = vrot.lane.b32.xlu0 %v354_v29, %s1103_s21  ;;  %v949_v30 = vpop.f32.mrb[2].mxu0 }
 0x1c1   :  { %v364_v31 = vsel %vm200_vm1, %v949_v30, 0.0  ;;  %v273_v32 = vpop.f32.mrb[3].mxu0 }
 0x1c2   :  { %v363_v33 = vsel %vm200_vm1, %v273_v32, 0.0 }
 0x1c3   :  { %979 = vmatprep.mubr.msk.f32.mxu1 %vm33_vm0, %v363_v33 }
 0x1c4   :  { %369 = vrot.lane.b32.xlu0 %v956_v28, %s1103_s21  ;;  %980 = vmatmul.mubr.msk.f32.vlgmr.msra.gmra.mrb[4].mxu1 %vm33_vm0, %v364_v31 }
 0x1c8   :  { %v967_v34 = vpop.f32.mrb[4].mxu0 }
 0x1c9   :  { %761 = vrot.lane.b32.xlu1 %v967_v34, %s1104_s0  ;;  %v453_v35 = vpop.f32.mrb[5].mxu0 }
 0x1cc   :  { %v970_v36 = vpop.f32.mrb[6].mxu0 }
 0x1cd   :  { %759 = vrot.lane.b32.xlu1 %v453_v35, %s1104_s0  ;;  %v463_v37 = vpop.f32.mrb[7].mxu0 }
 0x1ce   :  { %763 = vrot.lane.b32.xlu0 %v463_v37, %s1104_s0 }
 0x1d1   :  { %765 = vrot.lane.b32.xlu1 %v970_v36, %s1104_s0 }
 0x232   :  { %v368_v38 = vpop.permute.xlu0 %367 }
 0x233   :  { %v373_v39 = vsel %vm200_vm1, 0.0, %v368_v38 }
 0x234   :  { %982 = vmatprep.mubr.msk.f32.mxu1 %vm33_vm0, %v373_v39 }
 0x236   :  { %v370_v40 = vpop.permute.xlu0 %369 }
 0x237   :  { %v374_v41 = vsel %vm200_vm1, 0.0, %v370_v40 }
 0x238   :  { %983 = vmatmul.mubr.msk.f32.gmra.mrb[6].mxu1 %vm33_vm0, %v374_v41 }
 0x239   :  { %1007 = vmatprep.mubr.msk.f32.mxu1 %vm33_vm0, %v363_v33 }
 0x23b   :  { %v762_v9 = vpop.permute.xlu1 %761 }
 0x23f   :  { %v760_v10 = vpop.permute.xlu1 %759 }
 0x243   :  { %v766_v11 = vpop.permute.xlu1 %765 }
 0x297   :  { %v981_v42 = vpop.f32.mrb[4].mxu1 }
 0x298   :  { %v570_v43 = vadd.f32 %v981_v42, %v967_v34  ;;  %v550_v44 = vpop.f32.mrb[5].mxu1  ;;  %777 = vrot.lane.b32.xlu1 %v981_v42, %s1105_s22 }
 0x299   :  { %v569_v45 = vadd.f32 %v550_v44, %v453_v35  ;;  %775 = vrot.lane.b32.xlu0 %v550_v44, %s1105_s22 }
 0x29a   :  { %v574_v54 = vadd.f32 %v570_v43, %v1185_v15 }
 0x29b   :  { %v1057_v46 = vpack.c.bf16 %v570_v43, %v569_v45  ;;  %v573_v58 = vadd.f32 %v569_v45, %v1173_v12  ;;  %v764_v12 = vpop.permute.xlu0 %763 }
 0x29d   :  { %1058 = vmatprep.subr.bf16.mxu0 %v1057_v46  ;;  %1066 = vmatprep.subr.bf16.mxu1 %v1057_v46 }
 0x29e   :  { %1060 = vmatpush3.bf16.msra.mxu0 %v1057_v46  ;;  %1068 = vmatpush3.bf16.msra.mxu1 %v1057_v46 }
 0x30a   :  { %v778_v13 = vpop.permute.xlu1 %777 }
 0x30b   :  { %v984_v47 = vpop.f32.mrb[6].mxu1 }
 0x30c   :  { %v572_v48 = vadd.f32 %v984_v47, %v970_v36  ;;  %v560_v49 = vpop.f32.mrb[7].mxu1  ;;  %781 = vrot.lane.b32.xlu1 %v984_v47, %s1105_s22 }
 0x30d   :  { %v571_v50 = vadd.f32 %v560_v49, %v463_v37  ;;  %779 = vrot.lane.b32.xlu0 %v560_v49, %s1105_s22 }
 0x30e   :  { %v576_v0 = vadd.f32 %v572_v48, %v1180_v14  ;;  %v776_v14 = vpop.permute.xlu0 %775 }
 0x30f   :  { %v1061_v51 = vpack.c.bf16 %v572_v48, %v571_v50  ;;  %v575_v4 = vadd.f32 %v571_v50, %v1154_v5 }
 0x311   :  { %1062 = vmatprep.subr.bf16.mxu0 %v1061_v51  ;;  %1070 = vmatprep.subr.bf16.mxu1 %v1061_v51 }
 0x312   :  { %1064 = vmatpush3.bf16.msra.mxu0 %v1061_v51  ;;  %1072 = vmatpush3.bf16.msra.mxu1 %v1061_v51 }
 0x315   :  { %994 = vmatmul.mubr.msk.f32.vlgmr.msra.gmra.mrb[8].mxu0 %vm33_vm0, %v22_v25  ;;  %1008 = vmatmul.mubr.msk.f32.vlgmr.msra.gmra.mrb[8].mxu1 %vm33_vm0, %v364_v31 }
 0x316   :  { %1010 = vmatprep.mubr.msk.f32.mxu1 %vm33_vm0, %v373_v39  ;;  %996 = vmatprep.mubr.msk.f32.mxu0 %vm33_vm0, %v23_v26 }
 0x319   :  { %997 = vmatmul.mubr.msk.f32.gmra.mrb[10].mxu0 %vm33_vm0, %v24_v27  ;;  %1011 = vmatmul.mubr.msk.f32.gmra.mrb[10].mxu1 %vm33_vm0, %v374_v41 }
 0x37e   :  { %v782_v15 = vpop.permute.xlu1 %781 }
 0x37f   :  { %v780_v16 = vpop.permute.xlu0 %779 }
 0x3e8   :  { %v995_v52 = vpop.f32.mrb[8].mxu0  ;;  %v1009_v53 = vpop.f32.mrb[8].mxu1 }
 0x3e9   :  { %v748_v55 = vadd.f32 %v1009_v53, %v995_v52  ;;  %820 = vst.msk [vmem:[#allocation2 + $0x18] sm:$0xff] %vm33_vm0, %v1009_v53  ;;  %v728_v56 = vpop.f32.mrb[9].mxu1  ;;  %793 = vrot.lane.b32.xlu1 %v995_v52, %s1106_s23  ;;  %v643_v57 = vpop.f32.mrb[9].mxu0 }
 0x3ea   :  { %818 = vst.msk [vmem:[#allocation2 + $0x8] sm:$0xff] %vm33_vm0, %v728_v56  ;;  %v747_v59 = vadd.f32 %v728_v56, %v643_v57  ;;  %791 = vrot.lane.b32.xlu0 %v643_v57, %s1106_s23 }
 0x3eb   :  { %v752_v60 = vadd.f32 %v748_v55, %v574_v54 }
 0x3ec   :  { %v751_v61 = vadd.f32 %v747_v59, %v573_v58  ;;  %v998_v62 = vpop.f32.mrb[10].mxu0  ;;  %v1012_v63 = vpop.f32.mrb[10].mxu1 }
 0x3ed   :  { %v750_v1 = vadd.f32 %v1012_v63, %v998_v62  ;;  %824 = vst.msk [vmem:[#allocation2 + $0x38] sm:$0xff] %vm33_vm0, %v1012_v63  ;;  %v738_v2 = vpop.f32.mrb[11].mxu1  ;;  %797 = vrot.lane.b32.xlu1 %v998_v62, %s1106_s23  ;;  %v653_v3 = vpop.f32.mrb[11].mxu0  ;;  %v804_v17 = vsel %vm33_vm0, %v752_v60, %v762_v9 }
 0x3ee   :  { %822 = vst.msk [vmem:[#allocation2 + $0x28] sm:$0xff] %vm33_vm0, %v738_v2  ;;  %v749_v6 = vadd.f32 %v738_v2, %v653_v3  ;;  %795 = vrot.lane.b32.xlu0 %v653_v3, %s1106_s23  ;;  %v803_v5 = vsel %vm33_vm0, %v751_v61, %v760_v10  ;;  %v809_v19 = vsel %vm807_vm3, %v804_v17, %v778_v13 }
 0x3ef   :  { %v754_v7 = vadd.f32 %v750_v1, %v576_v0  ;;  %v808_v22 = vsel %vm807_vm3, %v803_v5, %v776_v14 }
 0x3f0   :  { %v753_v8 = vadd.f32 %v749_v6, %v575_v4 }
 0x3f1   :  { %v806_v23 = vsel %vm33_vm0, %v754_v7, %v766_v11 }
 0x3f2   :  { %v805_v25 = vsel %vm33_vm0, %v753_v8, %v764_v12  ;;  %v811_v27 = vsel %vm807_vm3, %v806_v23, %v782_v15 }
 0x3f3   :  { %v810_v30 = vsel %vm807_vm3, %v805_v25, %v780_v16 }
 0x45b   :  { %v794_v18 = vpop.permute.xlu1 %793 }
 0x45c   :  { %v814_v20 = vsel %vm812_vm4, %v809_v19, %v794_v18  ;;  %v792_v21 = vpop.permute.xlu0 %791 }
 0x45d   :  { %819 = vst [vmem:[#allocation2 + $0x10] sm:$0xff] %v814_v20  ;;  %v813_v24 = vsel %vm812_vm4, %v808_v22, %v792_v21 }
 0x45e   :  { %817 = vst [vmem:[#allocation2] sm:$0xff] %v813_v24 }
 0x45f   :  { %v798_v26 = vpop.permute.xlu1 %797 }
 0x460   :  { %v816_v28 = vsel %vm812_vm4, %v811_v27, %v798_v26  ;;  %v796_v29 = vpop.permute.xlu0 %795 }
 0x461   :  { %823 = vst [vmem:[#allocation2 + $0x30] sm:$0xff] %v816_v28  ;;  %v815_v31 = vsel %vm812_vm4, %v810_v30, %v796_v29 }
 0x462   :  { %821 = vst [vmem:[#allocation2 + $0x20] sm:$0xff] %v815_v31 }
 0x463   :  { %1090 = shalt.err (!%p1087_p4)
}
 0x464   :  { %s1091_s29 = scalar_lea.hbm %s1273_s5, 1024 }
 0x465   :  { %p1092_p5 = scmp.ne.s32.totalorder %s1273_s5, %s1091_s29  ;;  %p1095_p6 = scmp.lt.u32.totalorder %s1091_s29, %s1273_s5 }
 0x467   :  { %p1097_p7 = pnand %p1095_p6, %p1092_p5 }
 0x469   :  { %1100 = shalt.err (!%p1097_p7)
}
 0x46a   :  { %s1108_s4 = smov 256  }
 0x46b   :  { %836 = dma.vmem_to_hbm [thread:$0]  %s831_s25, 1024, %s1273_s5, [#allocation3], %s1108_s4, %s1108_s4, %s1103_s21  }
 0x46c   :  { %1101 = dma.done.wait [#allocation3], 1024  }
 0x46d   :  { %1102 = vsyncadd [#allocation3], 4294966272 }
 0x46e   :  { %840 = vsyncpa [#allocation3], 1 }

</bundles_post_ra>
